<compile_context>
chip_gen: v7x
topology: tpu7x:2x2x1
jax: 0.10.0
libtpu: 0.0.40
codegen_flags: <defaults>
</compile_context>

<pallas_src>
import functools
import math

import jax
import jax.numpy as jnp
from jax.experimental import pallas as pl
from jax.experimental.pallas import tpu as pltpu


def _arcface_kernel(logits_ref, labels_ref, out_ref, *, s, cos_m, sin_m, tile_c):
    """One (TILE_N, TILE_C) tile of the ArcFace forward."""
    j = pl.program_id(1)                                    # C-tile index
    x = logits_ref[...]                                     # (tn, tc), native dtype
    lab = labels_ref[...]                                   # (tn, 1) int32 labels

    # Local (within-tile) column index of each row's target class.  Labels of
    # -1 (ignore) or labels belonging to another C-tile fall outside [0, tc)
    # and can never match the non-negative iota, so no extra mask is needed.
    lab_local = lab - j * tile_c                            # (tn, 1) int32
    col = jax.lax.broadcasted_iota(jnp.int32, x.shape, dimension=1)
    is_target = col == lab_local                            # (tn, tc) bool

    # cos(arccos(x) + m) = x*cos(m) - sqrt(1 - x^2)*sin(m).  The correction is
    # computed in f32 (margin accuracy for |x| near 1); clamp 1 - x^2 at 0 so
    # fp noise from the preceding normalized matmul cannot produce NaN.
    xf = x.astype(jnp.float32)
    sin_theta = jnp.sqrt(jnp.maximum(jnp.float32(1.0) - xf * xf, jnp.float32(0.0)))
    target = xf * jnp.float32(s * cos_m) - sin_theta * jnp.float32(s * sin_m)

    if jnp.dtype(out_ref.dtype) == jnp.dtype(jnp.bfloat16):
        # Keep the bulk (scale + select) on packed bf16 vregs; `s` is a power
        # of two in the common case so x*s stays exact.
        xs = x * jnp.asarray(s, dtype=x.dtype)
        out_ref[...] = jnp.where(is_target, target.astype(x.dtype), xs)
    else:
        xs = xf * jnp.float32(s)
        out_ref[...] = jnp.where(is_target, target, xs).astype(out_ref.dtype)


def arcface_forward(logits, labels, *, s=64.0, margin=0.5,
                    tile_n=256, tile_c=4096, inplace=False):
    """ArcFace forward.

    logits: (N, C) cosine logits (f32 or bf16), values in [-1, 1].
    labels: (N,) int labels; -1 = ignore (no margin applied to that row).
    Returns an (N, C) array in the input dtype equal to
    s * cos(arccos(logits) + margin at the target positions).
    """
    n, c = logits.shape
    labels2d = labels.astype(jnp.int32).reshape(n, 1)

    # Clip tiles to the array extents; full-extent blocks are always legal,
    # otherwise tiles stay (8, 128)-aligned.
    tn = min(tile_n, n)
    tc = min(tile_c, c)
    grid = (pl.cdiv(n, tn), pl.cdiv(c, tc))

    kernel = functools.partial(
        _arcface_kernel,
        s=float(s),
        cos_m=math.cos(margin),
        sin_m=math.sin(margin),
        tile_c=tc,
    )

    itemsize = jnp.dtype(logits.dtype).itemsize
    tile_bytes = tn * tc * itemsize
    # Double-buffered logits-in + out tiles plus slack; floored at 16 MiB and
    # capped at 48 MiB so the limit is legal on every generation (v5e/v6e
    # 128 MiB physical, v7x 64 MiB physical).
    vmem_limit = min(max(4 * tile_bytes + (2 << 20), 16 << 20), 48 << 20)

    cost = pl.CostEstimate(
        flops=9 * n * c,                 # mul/sub/select/scale per element
        transcendentals=n * c,           # one sqrt per element
        bytes_accessed=2 * n * c * itemsize + n * 4,
    )

    extra_kwargs = {}
    if inplace:
        # The PyTorch module mutates logits in place; allow buffer aliasing
        # when the caller donates the (potentially huge) logits buffer.
        extra_kwargs["input_output_aliases"] = {0: 0}

    return pl.pallas_call(
        kernel,
        out_shape=jax.ShapeDtypeStruct((n, c), logits.dtype),
        grid=grid,
        in_specs=[
            pl.BlockSpec((tn, tc), lambda i, j: (i, j)),   # logits tile
            pl.BlockSpec((tn, 1), lambda i, j: (i, 0)),    # per-row labels
        ],
        out_specs=pl.BlockSpec((tn, tc), lambda i, j: (i, j)),
        compiler_params=pltpu.CompilerParams(
            dimension_semantics=("parallel", "parallel"),
            vmem_limit_bytes=vmem_limit,
        ),
        cost_estimate=cost,
        **extra_kwargs,
    )(logits, labels2d)


def arcface_ref(logits, labels, *, s=64.0, margin=0.5):
    """Pure-JAX reference matching the PyTorch forward (arccos/cos chain)."""
    n, c = logits.shape
    col = jnp.arange(c, dtype=jnp.int32)[None, :]
    lab = labels.astype(jnp.int32)[:, None]
    is_target = (col == lab) & (lab != -1)
    theta = jnp.arccos(logits.astype(jnp.float32))
    theta = jnp.where(is_target, theta + margin, theta)
    return (jnp.cos(theta) * s).astype(logits.dtype)


if __name__ == "__main__":
    key = jax.random.PRNGKey(0)
    k1, k2 = jax.random.split(key)

    # Small shapes; C on the lane axis.
    N, C = 16, 256
    logits = jax.random.uniform(k1, (N, C), jnp.float32, minval=-0.99, maxval=0.99)
    labels = jax.random.randint(k2, (N,), 0, C, dtype=jnp.int32)
    labels = labels.at[3].set(-1)   # exercise the ignore (-1) path

    # Tiny (8, 128) tiles force a real 2x2 grid so the per-C-tile label offset
    # path is exercised.
    out = jax.block_until_ready(
        arcface_forward(logits, labels, s=64.0, margin=0.5, tile_n=8, tile_c=128))
    ref = arcface_ref(logits, labels, s=64.0, margin=0.5)
    assert out.shape == (N, C) and out.dtype == jnp.float32
    assert jnp.allclose(out, ref, atol=1e-3, rtol=1e-3), "mismatch (f32, tiled)"

    # Production-sized default tiles (single block on this tiny array) to make
    # sure that configuration compiles too.
    out2 = jax.block_until_ready(arcface_forward(logits, labels))
    assert jnp.allclose(out2, ref, atol=1e-3, rtol=1e-3), "mismatch (f32, default tiles)"

    # bf16 I/O path: packed bf16 select/scale, f32 correction term.
    logits_bf = logits.astype(jnp.bfloat16)
    out_bf = jax.block_until_ready(
        arcface_forward(logits_bf, labels, s=64.0, margin=0.5, tile_n=16, tile_c=128))
    ref_bf = arcface_ref(logits_bf, labels, s=64.0, margin=0.5)
    assert out_bf.dtype == jnp.bfloat16
    assert jnp.allclose(out_bf.astype(jnp.float32), ref_bf.astype(jnp.float32),
                        atol=0.75, rtol=0.02), "mismatch (bf16)"

    print("KERNEL_OK")
</pallas_src>

<mosaic_0001>
module attributes {stable_mosaic.version = 11 : i64} {
  func.func @_arcface_kernel(%arg0: i32, %arg1: i32, %arg2: memref<8x128xf32, #tpu.memory_space<vmem>>, %arg3: memref<8x1xi32, #tpu.memory_space<vmem>>, %arg4: memref<8x128xf32, #tpu.memory_space<vmem>>) attributes {dimension_semantics = [#tpu.dimension_semantics<parallel>, #tpu.dimension_semantics<parallel>], iteration_bounds = array<i64: 2, 2>, scalar_prefetch = 0 : i64, scratch_operands = 0 : i64, tpu.core_type = #tpu.core_type<tc>, window_params = [{transform_indices = @transform_0, window_bounds = array<i64: 8, 128>}, {transform_indices = @transform_1, window_bounds = array<i64: 8, 1>}, {transform_indices = @transform_2, window_bounds = array<i64: 8, 128>}]} {
    %c0 = arith.constant 0 : index
    %c0_0 = arith.constant 0 : index
    %0 = vector.load %arg2[%c0, %c0_0] : memref<8x128xf32, #tpu.memory_space<vmem>>, vector<8x128xf32>
    %c0_1 = arith.constant 0 : index
    %c0_2 = arith.constant 0 : index
    %1 = vector.load %arg3[%c0_1, %c0_2] : memref<8x1xi32, #tpu.memory_space<vmem>>, vector<8x1xi32>
    %c128_i32 = arith.constant 128 : i32
    %2 = arith.muli %arg1, %c128_i32 : i32
    %3 = vector.broadcast %2 : i32 to vector<8x1xi32>
    %4 = arith.subi %1, %3 : vector<8x1xi32>
    %5 = tpu.iota {dimensions = array<i32: 1>} : vector<8x128xi32>
    %6 = vector.broadcast %4 : vector<8x1xi32> to vector<8x128xi32>
    %7 = arith.cmpi eq, %5, %6 : vector<8x128xi32>
    %8 = arith.mulf %0, %0 : vector<8x128xf32>
    %cst = arith.constant 1.000000e+00 : f32
    %9 = vector.broadcast %cst : f32 to vector<8x128xf32>
    %10 = arith.subf %9, %8 : vector<8x128xf32>
    %cst_3 = arith.constant 0.000000e+00 : f32
    %11 = vector.broadcast %cst_3 : f32 to vector<8x128xf32>
    %12 = arith.maximumf %10, %11 : vector<8x128xf32>
    %13 = math.sqrt %12 : vector<8x128xf32>
    %cst_4 = arith.constant 56.1652832 : f32
    %14 = vector.broadcast %cst_4 : f32 to vector<8x128xf32>
    %15 = arith.mulf %0, %14 : vector<8x128xf32>
    %cst_5 = arith.constant 30.6832352 : f32
    %16 = vector.broadcast %cst_5 : f32 to vector<8x128xf32>
    %17 = arith.mulf %13, %16 : vector<8x128xf32>
    %18 = arith.subf %15, %17 : vector<8x128xf32>
    %cst_6 = arith.constant 6.400000e+01 : f32
    %19 = vector.broadcast %cst_6 : f32 to vector<8x128xf32>
    %20 = arith.mulf %0, %19 : vector<8x128xf32>
    %21 = arith.select %7, %18, %20 : vector<8x128xi1>, vector<8x128xf32>
    %c0_7 = arith.constant 0 : index
    %c0_8 = arith.constant 0 : index
    %22 = vector.load %arg4[%c0_7, %c0_8] : memref<8x128xf32, #tpu.memory_space<vmem>>, vector<8x128xf32>
    tpu.vector_store %arg4[%c0_7, %c0_8], %21 {strides = array<i32>} : memref<8x128xf32, #tpu.memory_space<vmem>>, vector<8x128xf32>,
    return
  }
  func.func @transform_0(%arg0: i32, %arg1: i32) -> (i32, i32) {
    %c0_i32 = arith.constant 0 : i32
    return %arg0, %arg1 : i32, i32
  }
  func.func @transform_1(%arg0: i32, %arg1: i32) -> (i32, i32) {
    %c0_i32 = arith.constant 0 : i32
    %c0_i32_0 = arith.constant 0 : i32
    return %arg0, %c0_i32 : i32, i32
  }
  func.func @transform_2(%arg0: i32, %arg1: i32) -> (i32, i32) {
    %c0_i32 = arith.constant 0 : i32
    return %arg0, %arg1 : i32, i32
  }
}

</mosaic_0001>

<bundles_post_ra>
// kernel: tpu_custom_call.1
= control target key start
LH: loop header
LB: loop body
LE: loop exit
PB: predicated region body
PF: predicated region fallthrough
CT: control target
= control target key end

     0   :  { %7 = vsyncpa [#allocation3], 0  ;;  %s785_s0 = inlined_call_operand.hbm [shape: f32[16,256], index: 0, kind: input, shape index: {}]   ;;  %s786_s1 = inlined_call_operand.vmem [shape: s32[16,1], index: 1, kind: input, shape index: {}]   ;;  %s787_s2 = inlined_call_operand.hbm [shape: f32[16,256], index: 2, kind: output, shape index: {}]  }
   0x1   :  { %9 = vsyncpa [#allocation3 + $0x1], 0 }
   0x2   :  { %10 = vsyncpa [#allocation4], 0 }
   0x3   :  { %12 = vsyncpa [#allocation4 + $0x1], 0  ;;  %s581_s9 = smov 0   ;;  %s583_s10 = smov 0  }
   0x4   :  { %s585_s11 = smov 0   ;;  %s587_s12 = smov 0  }
   0x5   :  { %s589_s13 = smov 0   ;;  %s591_s14 = smov 0  }
   0x6   :  { %s593_s15 = smov 0   ;;  %s595_s16 = smov 0  }
   0x7 LB: > { %s334_s17 = sadd.s32 4294967295, %s561_s16   ;;  %s335_s18 = sadd.s32 4294967294, %s561_s16   ;;  %s561_s16 = sphi %s595_s16, %s18_s16   ;;  %s557_s15 = sphi %s593_s15, %s804_s15   ;;  %s553_s14 = sphi %s591_s14, %s803_s14   ;;  %s549_s13 = sphi %s589_s13, %s802_s13   ;;  %s545_s12 = sphi %s587_s12, %s801_s12   ;;  %s541_s11 = sphi %s585_s11, %s800_s11   ;;  %s537_s10 = sphi %s583_s10, %s799_s10   ;;  %s533_s9 = sphi %s581_s9, %s798_s9  }
   0x8   : > { %s27_s19 = sadd.s32 1, %s553_s14  ;;  %s30_s20 = sadd.s32 1, %s557_s15 }
   0x9   : > { %p28_p0 = scmp.ge.s32.totalorder %s27_s19, 2  ;;  %s39_s21 = sadd.s32 1, %s541_s11 }
   0xa   : > { %p46_p1 = scmp.ne.s32.totalorder %s541_s11, %s537_s10  ;;  %p47_p2 = scmp.eq.s32.totalorder %s561_s16, 0 }
   0xb   : > { %s806_s19 = smov (%p28_p0, %s27_s19), 0  ;;  %s808_s20 = smov (!%p28_p0, %s30_s20), %s557_s15 }
   0xc   : > { %s35_s22 = ssub.s32 %s553_s14, %s806_s19  ;;  %p634_p3 = por %p47_p2, %p46_p1 }
   0xd   : > { %p32_p4 = scmp.ge.s32.totalorder %s808_s20, 2  ;;  %p52_p5 = scmp.ne.s32.totalorder %s537_s10, %s533_s9 }
   0xe   : > { %p53_p6 = scmp.eq.s32.totalorder %s334_s17, 0  ;;  %p104_p7 = scmp.eq.s32.totalorder %s334_s17, 3 }
   0xf   : > { %s810_s20 = smov (%p32_p4, %s808_s20), 0  ;;  %p110_p10 = scmp.eq.s32.totalorder %s335_s18, 3 }
  0x10   : > { %p642_p8 = por %p53_p6, %p52_p5  ;;  %p646_p9 = por %p104_p7, %p46_p1 }
  0x11   : > { %s34_s26 = ssub.s32 %s557_s15, %s810_s20  ;;  %p652_p12 = por %p110_p10, %p52_p5 }
  0x12   : > { %s791_s25 = scalar_select %p646_p9, 1, 0 }
  0x13   : > { %s36_s27 = sor.u32 %s35_s22, %s34_s26  ;;  %p363_p13 = scmp.lt.s32.totalorder %s561_s16, 4 }
  0x14   : > { %p37_p11 = scmp.eq.s32.totalorder %s36_s27, 0  ;;  %s130_s29 = sand.u32 1, %s541_s11  }
  0x15   : > { %s792_s28 = scalar_select %p652_p12, 1, 0 }
  0x16   : > { %s659_s30 = scalar_select %p37_p11, %s541_s11, %s39_s21  }
  0x17   : > { %s338_s3 = sshll.u32 %s130_s29, 3  ;;  %s339_s4 = sshll.u32 %s557_s15, 1 }
  0x18   : > { %s139_s5 = sadd.s32 %s553_s14, %s339_s4  ;;  %s134_s6 = scalar_lea.vmem [#allocation2], %s338_s3 }
  0x19   : > { %s143_s7 = sshll.u32 %s134_s6, 4  ;;  %s340_s8 = sshll.u32 %s139_s5, 7  ;;  %s663_s7 = int_to_ptr.vmem [resolvable:$true] %s143_s7 }
  0x1a   : > { %s668_s22 = scalar_lea.hbm %s785_s0, %s340_s8  ;;  %p672_p0 = pnand %p363_p13, %p634_p3 }
  0x1b   : > { %s131_s26 = scalar_lea.sflag [#allocation3], %s130_s29  ;;  %s433_s27 = scalar_lea.hbm %s668_s22, 128 }
  0x1c   : > { %p434_p4 = scmp.ne.s32.totalorder %s668_s22, %s433_s27  ;;  %p435_p5 = pneg %p672_p0 }
  0x1d   : > { %s438_s4 = scalar_lea.hbm %s785_s0, 512  ;;  %p439_p3 = scmp.lt.u32.totalorder %s668_s22, %s785_s0 }
  0x1e   : > { %p436_p6 = pnand %p435_p5, %p434_p4  ;;  %p440_p10 = scmp.lt.u32.totalorder %s438_s4, %s433_s27 }
  0x1f   : > { %p442_p13 = scmp.lt.u32.totalorder %s433_s27, %s668_s22 }
  0x20   : > { %p437_p7 = pneg %p436_p6  ;;  %p441_p11 = por %p440_p10, %p439_p3 }
  0x22   : > { %p443_p1 = por %p442_p13, %p441_p11 }
  0x24   : > { %p444_p2 = pnand %p443_p1, %p437_p7 }
  0x26   : > { %447 = shalt.err (!%p444_p2)
}
  0x27   : > { %s448_s29 = scalar_lea.vmem %s663_s7, 128  ;;  %s563_s8 = smov [#allocation2]  }
  0x28   : > { %p449_p4 = scmp.ne.s32.totalorder %s663_s7, %s448_s29  ;;  %s453_s17 = sshll.u32 %s563_s8, 4  ;;  %s454_s17 = int_to_ptr.vmem [resolvable:$false] %s453_s17 }
  0x29   : > { %s455_s18 = scalar_lea.vmem %s454_s17, 256  ;;  %p456_p9 = scmp.lt.s32.totalorder %s663_s7, %s454_s17 }
  0x2a   : > { %p451_p6 = pnand %p449_p4, %p435_p5  ;;  %p457_p3 = scmp.lt.s32.totalorder %s455_s18, %s448_s29 }
  0x2c   : > { %p452_p12 = pneg %p451_p6  ;;  %p458_p10 = por %p457_p3, %p456_p9 }
  0x2e   : > { %p459_p11 = pnand %p458_p10, %p452_p12 }
  0x30   : > { %462 = shalt.err (!%p459_p11)
}
  0x31   : > { %358 = dma.hbm_to_vmem [thread:$0]  (!%p672_p0), %s668_s22, 128, %s663_s7, %s131_s26  }
  0x32   : > { %p794_p1 = scmp.lt.s32.totalorder %s561_s16, 5  ;;  %p795_p2 = scmp.ge.s32.totalorder %s561_s16, 1 }
  0x34   : > { %p156_p5 = pnand %p795_p2, %p794_p1 }
  0x35   : > { %s708_s27 = sand.u32 (!%p156_p5), 1, %s537_s10  }
  0x36   : > { %159 = sbr.rel (%p156_p5) target bundleno = 215 (0xd7), region = 28  ;;  %s342_s23 = sshll.u32 (!%p156_p5), %s708_s27, 3 }
  0x37   : > { %s162_s3 = scalar_lea.sflag (!%p156_p5), [#allocation3], %s708_s27  ;;  %s165_s21 = scalar_lea.vmem (!%p156_p5), [#allocation2], %s342_s23 }
  0x3d   : > { %524 = dma.done.wait (%p642_p8), %s162_s3, 128  }
  0x3e   : > { %526 = vsyncadd (%p642_p8), %s162_s3, 4294967168  ;;  %p190_p9 = scmp.lt.s32.totalorder %s549_s13, 1  ;;  %v564_v0 = vmov 0   ;;  %s345_s7 = sshll.u32 %s545_s12, 7  ;;  %v194_v4 = vld [vmem:[%s165_s21] sm:$0xff]  ;;  %v199_v13 = vlaneseq }
  0x3f   : > { %430 = vset.pattern.permute.xlu0 %v564_v0  ;;  %v197_v1 = vstv %s345_s7  ;;  %v205_v5 = vmul.f32 %v194_v4, %v194_v4  ;;  %s347_s24 = sshll.u32 %s549_s13, 1  ;;  %v215_v14 = vmul.f32 56.165283, %v194_v4  ;;  %v218_v18 = vmul.f32 64.0, %v194_v4  ;;  %s189_s17 = scalar_lea.vmem [#allocation5], %s342_s23 }
  0x40   : > { %s191_s22 = scalar_select %p190_p9, %s549_s13, 1  ;;  %v200_v16 = vand.u32 127, %v199_v13 }
  0x41   : > { %v206_v6 = vsub.f32 1.0, %v205_v5  ;;  %s233_s29 = sadd.s32 %s545_s12, %s347_s24  ;;  %s237_s18 = sshll.u32 %s189_s17, 4  ;;  %s733_s18 = int_to_ptr.vmem [resolvable:$true] %s237_s18 }
  0x42   : > { %s344_s26 = sshll.u32 %s191_s22, 3  ;;  %s348_s8 = sshll.u32 %s233_s29, 7 }
  0x43   : > { %s193_s6 = scalar_lea.vmem %s786_s1, %s344_s26  ;;  %v207_v7 = vmax.f32 %v206_v6, 0.0  ;;  %s731_s7 = scalar_lea.hbm %s787_s2, %s348_s8 }
  0x44   : > { %v195_v2 = vld [vmem:[%s193_s6] sm:$0xff]  ;;  %s222_s12 = scalar_lea.sflag [#allocation4], %s708_s27  ;;  %s463_s13 = scalar_lea.vmem %s733_s18, 128 }
  0x45   : > { %v198_v3 = vsub.s32 %v195_v2, %v197_v1  ;;  %431 = vrsqrt.f32 %v207_v7  ;;  %vm210_vm0 = vcmp.eq.f32.partialorder %v207_v7, inf  ;;  %v213_v10 = vand.u32 2147483648, %v207_v7  ;;  %p464_p8 = scmp.ne.s32.totalorder %s733_s18, %s463_s13  ;;  %p796_p12 = scmp.ne.s32.totalorder %s791_s25, 0 }
  0x46   : > { %vm212_vm1 = vcmp.eq.f32.partialorder %v207_v7, 0.0  ;;  %s565_s23 = smov [#allocation5]  }
  0x47   : > { %202 = vperm.xlu0 %430, %v198_v3   ;;  %p465_p0 = pnand %p464_p8, %p796_p12  ;;  %s467_s22 = sshll.u32 %s565_s23, 4  ;;  %s468_s22 = int_to_ptr.vmem [resolvable:$false] %s467_s22 }
  0x48   : > { %s469_s26 = scalar_lea.vmem %s468_s22, 256  ;;  %p470_p13 = scmp.lt.s32.totalorder %s733_s18, %s468_s22 }
  0x49   : > { %p466_p7 = pneg %p465_p0  ;;  %p471_p4 = scmp.lt.s32.totalorder %s469_s26, %s463_s13 }
  0x4b   : > { %p472_p6 = por %p471_p4, %p470_p13 }
  0x4d   : > { %p473_p3 = pnand %p472_p6, %p466_p7 }
  0x4f   : > { %v432_v8 = vpop.eup %431 }
  0x50   : > { %v209_v9 = vmul.f32 %v432_v8, %v207_v7 }
  0x52   : > { %v211_v11 = vsel %vm210_vm0, %v207_v7, %v209_v9 }
  0x53   : > { %v214_v12 = vsel %vm212_vm1, %v213_v10, %v211_v11 }
  0x54   : > { %v216_v15 = vmul.f32 30.683235, %v214_v12 }
  0x56   : > { %v217_v17 = vsub.f32 %v215_v14, %v216_v15 }
  0xc6   : > { %v203_v19 = vpop.permute.xlu0 %202 }
  0xc7   : > { %vm204_vm2 = vcmp.eq.s32.totalorder %v200_v16, %v203_v19 }
  0xc8   : > { %v219_v20 = vsel %vm204_vm2, %v217_v17, %v218_v18 }
  0xc9   : > { %220 = vst [vmem:[%s189_s17] sm:$0xff] %v219_v20 }
  0xca   : > { %476 = shalt.err (!%p473_p3)
}
  0xcb   : > { %s477_s27 = scalar_lea.hbm %s731_s7, 128  ;;  %s481_s6 = scalar_lea.hbm %s787_s2, 512 }
  0xcc   : > { %p478_p10 = scmp.ne.s32.totalorder %s731_s7, %s477_s27  ;;  %p482_p2 = scmp.lt.u32.totalorder %s731_s7, %s787_s2 }
  0xcd   : > { %p483_p5 = scmp.lt.u32.totalorder %s481_s6, %s477_s27  ;;  %p485_p8 = scmp.lt.u32.totalorder %s477_s27, %s731_s7 }
  0xce   : > { %p479_p11 = pnand %p478_p10, %p796_p12 }
  0xcf   : > { %p484_p9 = por %p483_p5, %p482_p2 }
  0xd0   : > { %p480_p1 = pneg %p479_p11 }
  0xd1   : > { %p486_p0 = por %p485_p8, %p484_p9 }
  0xd3   : > { %p487_p7 = pnand %p486_p0, %p480_p1 }
  0xd5   : > { %490 = shalt.err (!%p487_p7)
}
  0xd6   : > { %353 = dma.vmem_to_hbm [thread:$0]  (%p796_p12), %s733_s18, 128, %s731_s7, %s222_s12  }
  0xd7 PF: > { %p364_p13 = scmp.ge.s32.totalorder %s561_s16, 2  ;;  %s249_s8 = sand.u32 1, %s533_s9  }
  0xd8   : > { %p797_p4 = scmp.ne.s32.totalorder %s792_s28, 0  ;;  %s250_s17 = scalar_lea.sflag [#allocation4], %s249_s8 }
  0xda   : > { %p360_p6 = pnand %p364_p13, %p797_p4 }
  0xdc   : > { %528 = dma.done.wait (!%p360_p6), %s250_s17, 128  }
  0xdd   : > { %530 = vsyncadd (!%p360_p6), %s250_s17, 4294967168  ;;  %s18_s16 = sadd.s32 1, %s561_s16   ;;  %s798_s9 = smov %s537_s10 }
  0xde   : > { %p15_p3 = scmp.ge.s32.totalorder %s18_s16, 6   ;;  %s799_s10 = smov %s541_s11 }
  0xdf   : > { %s800_s11 = smov %s659_s30  ;;  %s801_s12 = smov %s553_s14 }
  0xe0   : > { %s802_s13 = smov %s557_s15  ;;  %s803_s14 = smov %s806_s19 }
  0xe1   : > { %s804_s15 = smov %s810_s20  ;;  %17 = sbr.rel (!%p15_p3) target bundleno = 7 (0x7), region = 76 }
  0xe8   :  { %255 = vsyncpa [#allocation3], 1 }
  0xe9   :  { %257 = vsyncpa [#allocation3 + $0x1], 1 }
  0xea   :  { %258 = vsyncpa [#allocation4], 1 }
  0xeb   :  { %260 = vsyncpa [#allocation4 + $0x1], 1 }

</bundles_post_ra>
